<compile_context>
chip_gen: v7x
topology: tpu7x:2x2x1
jax: 0.10.0
libtpu: 0.0.40
codegen_flags: <defaults>
</compile_context>

<pallas_src>
import math

import jax
import jax.numpy as jnp
from jax.experimental import pallas as pl
from jax.experimental.pallas import tpu as pltpu


def _round_up(x, m):
    return ((x + m - 1) // m) * m


def dnq_mlp_kernel(x_ref, w1_ref, b1_ref, w2_ref, b2_ref, o_ref):
    # Cast x to the compute dtype in VMEM (avoids an extra HBM pass over x).
    x = x_ref[...].astype(w1_ref.dtype)
    # hidden = relu(x @ W1 + b1); MXU accumulates in f32, bias/ReLU in f32.
    h = jnp.dot(x, w1_ref[...], preferred_element_type=jnp.float32)
    h = jnp.maximum(h + b1_ref[...], 0.0)                 # (TB, H) + (1, H)
    # out = hidden @ W2 + b2 (hidden cast to operand dtype, f32 accumulation).
    y = jnp.dot(h.astype(w2_ref.dtype), w2_ref[...],
                preferred_element_type=jnp.float32)
    o_ref[...] = (y + b2_ref[...]).astype(o_ref.dtype)    # (TB, n_out)


def dnq_forward(x, w1, b1, w2, b2, *, block_b=2048, compute_dtype=None):
    """x: (B, n_in); w1: (n_in, H); b1: (1, H); w2: (H, n_out); b2: (1, n_out).

    compute_dtype: dtype for the MXU operands (e.g. jnp.bfloat16); accumulation,
    bias add and ReLU remain f32.  Output keeps x.dtype.  With the default
    (compute_dtype == x.dtype == f32) the result matches the f32 reference.
    """
    B, n_in = x.shape
    H = w1.shape[1]
    n_out = w2.shape[1]
    out_dtype = x.dtype
    if compute_dtype is None:
        compute_dtype = x.dtype

    # Weights/biases are tiny -> cast at the boundary (negligible); x is cast
    # inside the kernel so there is no extra HBM pass over the batch.
    w1c = w1.astype(compute_dtype)
    w2c = w2.astype(compute_dtype)
    b1f = b1.reshape(1, H).astype(jnp.float32)
    b2f = b2.reshape(1, n_out).astype(jnp.float32)

    # Batch tiling.  x / out blocks are f32 at the kernel boundary, so an
    # 8-row sublane multiple is enough.  Big tiles amortize the ~0.35 us/step
    # grid overhead; when B is large enough we keep the grid length >= 2 so
    # the "parallel" batch axis can be split across v7x's two TensorCores.
    sub = 8
    if B >= 2 * sub:
        tb = _round_up((B + 1) // 2, sub)   # grid of (at least) 2
    else:
        tb = _round_up(B, sub)
    tb = max(sub, min(tb, block_b))

    B_p = _round_up(B, tb)
    xp = x if B_p == B else jnp.pad(x, ((0, B_p - B), (0, 0)))
    grid = (B_p // tb,)

    cd_item = jnp.dtype(compute_dtype).itemsize
    cost = pl.CostEstimate(
        flops=2 * B_p * (n_in * H + H * n_out),
        transcendentals=0,
        bytes_accessed=(B_p * n_in * jnp.dtype(x.dtype).itemsize   # x
                        + n_in * H * cd_item                       # W1
                        + H * n_out * cd_item                      # W2
                        + (H + n_out) * 4                          # biases (f32)
                        + B_p * n_out * jnp.dtype(out_dtype).itemsize),
    )

    out = pl.pallas_call(
        dnq_mlp_kernel,
        out_shape=jax.ShapeDtypeStruct((B_p, n_out), out_dtype),
        grid_spec=pltpu.PrefetchScalarGridSpec(
            num_scalar_prefetch=0,
            grid=grid,
            in_specs=[
                pl.BlockSpec((tb, n_in), lambda i: (i, 0)),    # x batch tile
                pl.BlockSpec((n_in, H), lambda i: (0, 0)),     # W1 VMEM-resident
                pl.BlockSpec((1, H), lambda i: (0, 0)),        # b1 resident
                pl.BlockSpec((H, n_out), lambda i: (0, 0)),    # W2 resident
                pl.BlockSpec((1, n_out), lambda i: (0, 0)),    # b2 resident
            ],
            out_specs=pl.BlockSpec((tb, n_out), lambda i: (i, 0)),
        ),
        compiler_params=pltpu.CompilerParams(
            dimension_semantics=("parallel",)),   # v7x: shard batch over 2 TCs
        cost_estimate=cost,
    )(xp, w1c, b1f, w2c, b2f)

    return out if B_p == B else out[:B]


def init_dnqnet_params(key, n_in, n_out, n_hidden=128, dtype=jnp.float32):
    """Deterministic parameter init matching the PyTorch module:
       layer1: kaiming_normal_ (fan_in, relu gain=sqrt(2)), bias=0
       layer2: kaiming_normal_ (fan_in, linear gain=1),     bias=0
    Weights are stored transposed relative to torch's (out, in) convention."""
    k1, k2 = jax.random.split(key)
    std1 = math.sqrt(2.0) / math.sqrt(n_in)     # relu nonlinearity, fan_in = n_in
    std2 = 1.0 / math.sqrt(n_hidden)            # linear nonlinearity, fan_in = n_hidden
    w1 = (jax.random.normal(k1, (n_in, n_hidden)) * std1).astype(dtype)
    b1 = jnp.zeros((1, n_hidden), dtype=dtype)
    w2 = (jax.random.normal(k2, (n_hidden, n_out)) * std2).astype(dtype)
    b2 = jnp.zeros((1, n_out), dtype=dtype)
    return w1, b1, w2, b2


if __name__ == "__main__":
    key = jax.random.PRNGKey(0)
    k_x, k_p, k_xb = jax.random.split(key, 3)

    n_in, n_hidden, n_out = 16, 128, 4
    w1, b1, w2, b2 = init_dnqnet_params(k_p, n_in, n_out, n_hidden)

    # --- small demo batch, f32 operands: exact check against pure JAX -------
    B_small = 8
    x_small = jax.random.normal(k_x, (B_small, n_in), dtype=jnp.float32)
    out_small = dnq_forward(x_small, w1, b1, w2, b2)
    jax.block_until_ready(out_small)
    ref_small = jnp.maximum(x_small @ w1 + b1, 0.0) @ w2 + b2
    assert out_small.shape == (B_small, n_out)
    assert jnp.allclose(out_small, ref_small, atol=1e-5, rtol=1e-5)

    # --- replay-buffer style batch: 2-step "parallel" grid, bf16 operands ---
    B_big = 1024
    x_big = jax.random.normal(k_xb, (B_big, n_in), dtype=jnp.float32)
    out_big = dnq_forward(x_big, w1, b1, w2, b2, compute_dtype=jnp.bfloat16)
    jax.block_until_ready(out_big)
    ref_big = jnp.maximum(x_big @ w1 + b1, 0.0) @ w2 + b2
    assert out_big.shape == (B_big, n_out)
    # bf16 operands / f32 accumulation -> loosened tolerance (exactness only
    # guaranteed for compute_dtype=float32).
    assert jnp.allclose(out_big, ref_big, atol=5e-2, rtol=5e-2)

    print("KERNEL_OK")
</pallas_src>

<mosaic_0001>
module attributes {stable_mosaic.version = 11 : i64} {
  func.func @dnq_mlp_kernel(%arg0: i32, %arg1: memref<8x16xf32, #tpu.memory_space<vmem>>, %arg2: memref<16x128xf32, #tpu.memory_space<vmem>>, %arg3: memref<1x128xf32, #tpu.memory_space<vmem>>, %arg4: memref<128x4xf32, #tpu.memory_space<vmem>>, %arg5: memref<1x4xf32, #tpu.memory_space<vmem>>, %arg6: memref<8x4xf32, #tpu.memory_space<vmem>>) attributes {dimension_semantics = [#tpu.dimension_semantics<parallel>], iteration_bounds = array<i64: 1>, scalar_prefetch = 0 : i64, scratch_operands = 0 : i64, tpu.core_type = #tpu.core_type<tc>, window_params = [{transform_indices = @transform_0, window_bounds = array<i64: 8, 16>}, {pipeline_mode = #tpu.pipeline_mode<synchronous>, transform_indices = @transform_1, window_bounds = array<i64: 16, 128>}, {pipeline_mode = #tpu.pipeline_mode<synchronous>, transform_indices = @transform_2, window_bounds = array<i64: 1, 128>}, {pipeline_mode = #tpu.pipeline_mode<synchronous>, transform_indices = @transform_3, window_bounds = array<i64: 128, 4>}, {pipeline_mode = #tpu.pipeline_mode<synchronous>, transform_indices = @transform_4, window_bounds = array<i64: 1, 4>}, {transform_indices = @transform_5, window_bounds = array<i64: 8, 4>}]} {
    %c0 = arith.constant 0 : index
    %c0_0 = arith.constant 0 : index
    %0 = vector.load %arg1[%c0, %c0_0] : memref<8x16xf32, #tpu.memory_space<vmem>>, vector<8x16xf32>
    %c0_1 = arith.constant 0 : index
    %c0_2 = arith.constant 0 : index
    %1 = vector.load %arg2[%c0_1, %c0_2] : memref<16x128xf32, #tpu.memory_space<vmem>>, vector<16x128xf32>
    %cst = arith.constant dense<0.000000e+00> : vector<8x128xf32>
    %2 = tpu.matmul %0, %1, %cst {dimension_numbers = #tpu.dot_dimension_numbers<[1], [0], [0], [1], [0, 0, 1, 1], [], []>} : vector<8x16xf32>, vector<16x128xf32>, vector<8x128xf32> -> vector<8x128xf32>
    %c0_3 = arith.constant 0 : index
    %c0_4 = arith.constant 0 : index
    %3 = vector.load %arg3[%c0_3, %c0_4] : memref<1x128xf32, #tpu.memory_space<vmem>>, vector<1x128xf32>
    %4 = vector.broadcast %3 : vector<1x128xf32> to vector<8x128xf32>
    %5 = arith.addf %2, %4 : vector<8x128xf32>
    %cst_5 = arith.constant 0.000000e+00 : f32
    %6 = vector.broadcast %cst_5 : f32 to vector<8x128xf32>
    %7 = arith.maximumf %5, %6 : vector<8x128xf32>
    %c0_6 = arith.constant 0 : index
    %c0_7 = arith.constant 0 : index
    %8 = vector.load %arg4[%c0_6, %c0_7] : memref<128x4xf32, #tpu.memory_space<vmem>>, vector<128x4xf32>
    %cst_8 = arith.constant dense<0.000000e+00> : vector<8x4xf32>
    %9 = tpu.matmul %7, %8, %cst_8 {dimension_numbers = #tpu.dot_dimension_numbers<[1], [0], [0], [1], [0, 0, 1, 1], [], []>} : vector<8x128xf32>, vector<128x4xf32>, vector<8x4xf32> -> vector<8x4xf32>
    %c0_9 = arith.constant 0 : index
    %c0_10 = arith.constant 0 : index
    %10 = vector.load %arg5[%c0_9, %c0_10] : memref<1x4xf32, #tpu.memory_space<vmem>>, vector<1x4xf32>
    %11 = vector.broadcast %10 : vector<1x4xf32> to vector<8x4xf32>
    %12 = arith.addf %9, %11 : vector<8x4xf32>
    %c0_11 = arith.constant 0 : index
    %c0_12 = arith.constant 0 : index
    %13 = vector.load %arg6[%c0_11, %c0_12] : memref<8x4xf32, #tpu.memory_space<vmem>>, vector<8x4xf32>
    tpu.vector_store %arg6[%c0_11, %c0_12], %12 {strides = array<i32>} : memref<8x4xf32, #tpu.memory_space<vmem>>, vector<8x4xf32>,
    return
  }
  func.func @transform_0(%arg0: i32) -> (i32, i32) {
    %c0_i32 = arith.constant 0 : i32
    %c0_i32_0 = arith.constant 0 : i32
    return %arg0, %c0_i32 : i32, i32
  }
  func.func @transform_1(%arg0: i32) -> (i32, i32) {
    %c0_i32 = arith.constant 0 : i32
    %c0_i32_0 = arith.constant 0 : i32
    %c0_i32_1 = arith.constant 0 : i32
    return %c0_i32, %c0_i32_0 : i32, i32
  }
  func.func @transform_2(%arg0: i32) -> (i32, i32) {
    %c0_i32 = arith.constant 0 : i32
    %c0_i32_0 = arith.constant 0 : i32
    %c0_i32_1 = arith.constant 0 : i32
    return %c0_i32, %c0_i32_0 : i32, i32
  }
  func.func @transform_3(%arg0: i32) -> (i32, i32) {
    %c0_i32 = arith.constant 0 : i32
    %c0_i32_0 = arith.constant 0 : i32
    %c0_i32_1 = arith.constant 0 : i32
    return %c0_i32, %c0_i32_0 : i32, i32
  }
  func.func @transform_4(%arg0: i32) -> (i32, i32) {
    %c0_i32 = arith.constant 0 : i32
    %c0_i32_0 = arith.constant 0 : i32
    %c0_i32_1 = arith.constant 0 : i32
    return %c0_i32, %c0_i32_0 : i32, i32
  }
  func.func @transform_5(%arg0: i32) -> (i32, i32) {
    %c0_i32 = arith.constant 0 : i32
    %c0_i32_0 = arith.constant 0 : i32
    return %arg0, %c0_i32 : i32, i32
  }
}

</mosaic_0001>

<bundles_post_ra>
// kernel: tpu_custom_call.1
= control target key start
LH: loop header
LB: loop body
LE: loop exit
PB: predicated region body
PF: predicated region fallthrough
CT: control target
= control target key end

     0   :  { %v299_v0 = vmov 0.0|0.0   ;;  %vm300_vm0 = vmmov 0   ;;  %v301_v3 = vmov 0.0   ;;  %vm30_vm1 = vcmask 130048   ;;  %s398_s1 = inlined_call_operand.vmem [shape: f32[16,128], index: 1, kind: input, shape index: {}]   ;;  %s399_s3 = inlined_call_operand.vmem [shape: f32[128,4], index: 3, kind: input, shape index: {}]   ;;  %s400_s0 = inlined_call_operand.vmem [shape: f32[8,16], index: 0, kind: input, shape index: {}]   ;;  %s401_s2 = inlined_call_operand.vmem [shape: f32[1,128], index: 2, kind: input, shape index: {}]   ;;  %s402_s4 = inlined_call_operand.vmem [shape: f32[1,4], index: 4, kind: input, shape index: {}]   ;;  %s403_s5 = inlined_call_operand.vmem [shape: f32[8,4], index: 5, kind: output, shape index: {}]  }
   0x1   :  { %269 = vmatprep.subr.bf16.mxu0 %v299_v0  ;;  %v21_v1 = vld [vmem:[%s398_s1] sm:$0xff]  ;;  %v22_v2 = vld [vmem:[%s398_s1 + $0x8] sm:$0xff]  ;;  %231 = vmatprep.mubr.msk.f32.mxu0 %vm300_vm0, %v301_v3  ;;  %v107_v7 = vld [vmem:[%s399_s3 + $0x10] sm:$0xff]  ;;  %vm198_vm2 = vcmask 31744  }
   0x2   :  { %v270_v4 = vpack.c.bf16 %v22_v2, %v21_v1  ;;  %272 = vmatprep.subr.bf16.mxu1 %v299_v0  ;;  %v105_v5 = vld [vmem:[%s399_s3] sm:$0xff]  ;;  %v106_v6 = vld [vmem:[%s399_s3 + $0x8] sm:$0xff]  ;;  %266 = vmatprep.mubr.msk.f32.mxu1 %vm300_vm0, %v301_v3  ;;  %v108_v9 = vld [vmem:[%s399_s3 + $0x18] sm:$0xff] }
   0x3   :  { %v273_v8 = vpack.c.bf16 %v106_v6, %v105_v5  ;;  %v20_v10 = vld [vmem:[%s400_s0] sm:$0xff]  ;;  %v276_v11 = vpack.c.bf16 %v108_v9, %v107_v7  ;;  %v110_v13 = vld [vmem:[%s399_s3 + $0x28] sm:$0xff]  ;;  %v111_v15 = vld [vmem:[%s399_s3 + $0x30] sm:$0xff] }
   0x4   :  { %271 = vmatpush3.bf16.msra.mxu0 %v270_v4  ;;  %v109_v12 = vld [vmem:[%s399_s3 + $0x20] sm:$0xff]  ;;  %v112_v16 = vld [vmem:[%s399_s3 + $0x38] sm:$0xff]  ;;  %v114_v19 = vld [vmem:[%s399_s3 + $0x48] sm:$0xff] }
   0x5   :  { %274 = vmatpush3.bf16.msra.mxu1 %v273_v8  ;;  %v279_v14 = vpack.c.bf16 %v110_v13, %v109_v12  ;;  %v282_v17 = vpack.c.bf16 %v112_v16, %v111_v15  ;;  %v113_v18 = vld [vmem:[%s399_s3 + $0x40] sm:$0xff]  ;;  %v115_v21 = vld [vmem:[%s399_s3 + $0x50] sm:$0xff]  ;;  %v116_v22 = vld [vmem:[%s399_s3 + $0x58] sm:$0xff] }
   0x6   :  { %275 = vmatprep.subr.bf16.mxu1 %v299_v0  ;;  %v285_v20 = vpack.c.bf16 %v114_v19, %v113_v18  ;;  %v288_v23 = vpack.c.bf16 %v116_v22, %v115_v21  ;;  %v117_v24 = vld [vmem:[%s399_s3 + $0x60] sm:$0xff]  ;;  %v118_v25 = vld [vmem:[%s399_s3 + $0x68] sm:$0xff]  ;;  %v119_v27 = vld [vmem:[%s399_s3 + $0x70] sm:$0xff] }
   0x7   :  { %232 = vmatmul.mubr.msk.f32.vlgmr.msra.gmra.mrb[0].mxu0 %vm30_vm1, %v20_v10  ;;  %v291_v26 = vpack.c.bf16 %v118_v25, %v117_v24  ;;  %v120_v28 = vld [vmem:[%s399_s3 + $0x78] sm:$0xff]  ;;  %v204_v30 = vld [vmem:[%s401_s2] ss:$0 sm:$0xff] }
   0x8   :  { %v294_v29 = vpack.c.bf16 %v120_v28, %v119_v27  ;;  %v206_v35 = vld [vmem:[%s402_s4] ss:$0 sm:$0xff] }
   0x9   :  { %277 = vmatpush3.bf16.msra.mxu1 %v276_v11 }
   0xa   :  { %278 = vmatprep.subr.bf16.mxu1 %v299_v0 }
   0xd   :  { %280 = vmatpush3.bf16.msra.mxu1 %v279_v14 }
   0xe   :  { %281 = vmatprep.subr.bf16.mxu1 %v299_v0 }
  0x11   :  { %283 = vmatpush3.bf16.msra.mxu1 %v282_v17 }
  0x12   :  { %284 = vmatprep.subr.bf16.mxu1 %v299_v0 }
  0x15   :  { %286 = vmatpush3.bf16.msra.mxu1 %v285_v20 }
  0x16   :  { %287 = vmatprep.subr.bf16.mxu1 %v299_v0 }
  0x19   :  { %289 = vmatpush3.bf16.msra.mxu1 %v288_v23 }
  0x1a   :  { %290 = vmatprep.subr.bf16.mxu1 %v299_v0 }
  0x1d   :  { %292 = vmatpush3.bf16.msra.mxu1 %v291_v26 }
  0x1e   :  { %293 = vmatprep.subr.bf16.mxu1 %v299_v0 }
  0x21   :  { %295 = vmatpush3.bf16.msra.mxu1 %v294_v29 }
  0xda   :  { %v100_v31 = vpop.f32.mrb[0].mxu0 }
  0xdb   :  { %v101_v32 = vadd.f32 %v204_v30, %v100_v31  ;;  %v233_v33 = vpop.f32.mrb[1].mxu0 }
  0xdd   :  { %v104_v34 = vmax.f32 %v101_v32, 0.0 }
  0xdf   :  { %267 = vmatmul.mubr.f32.vlgmr.msra.gmra.mrb[0].mxu1 %v104_v34 }
 0x1b2   :  { %v194_v36 = vpop.f32.mrb[0].mxu1 }
 0x1b3   :  { %v195_v37 = vadd.f32 %v206_v35, %v194_v36  ;;  %v268_v38 = vpop.f32.mrb[1].mxu1 }
 0x1b5   :  { %199 = vst.msk [vmem:[%s403_s5] sm:$0xff] %vm198_vm2, %v195_v37 }

</bundles_post_ra>
